<compile_context>
chip_gen: v7x
topology: tpu7x:2x2x1
jax: 0.10.0
libtpu: 0.0.40
codegen_flags: <defaults>
</compile_context>

<pallas_src>
import functools

import jax
import jax.numpy as jnp
from jax import lax
from jax.experimental import pallas as pl
from jax.experimental.pallas import tpu as pltpu


def _cdiv(a, b):
    return -(-a // b)


def _round_up(v, m):
    return (v + m - 1) // m * m


def _min_value(dt):
    """Identity element for max() that is representable in dtype `dt`."""
    dt = jnp.dtype(dt)
    if jnp.issubdtype(dt, jnp.integer):
        return int(jnp.iinfo(dt).min)
    if dt in (jnp.dtype(jnp.float64), jnp.dtype(jnp.float32),
              jnp.dtype(jnp.bfloat16), jnp.dtype(jnp.float16)):
        return float("-inf")
    # fp8-style dtypes without inf: most negative finite value is a safe
    # identity for a max-reduction.
    return float(jnp.finfo(dt).min)


def _global_max_kernel(x_ref, o_ref, acc_ref, *, hw, thw, block_stride,
                       nacc, min_val, needs_mask):
    # x_ref:   (tn_rows, thw)   current (row-tile, hw-tile) of (N*C, H*W) input
    # o_ref:   (1, tn_rows, 1)  pooled max for this (hw-split, row-tile)
    # acc_ref: (tn_rows, 128)   running lane-wise max accumulator (VMEM scratch)
    j = pl.program_id(2)

    @pl.when(j == 0)
    def _init():
        acc_ref[...] = jnp.full(acc_ref.shape, min_val, acc_ref.dtype)

    rows = x_ref.shape[0]
    n_chunks = thw // 128

    # Global hw-block index actually loaded by the index_map (no clamp needed:
    # the stride/ceil split keeps every block index in bounds; overlapping
    # blocks between splits are harmless because max is idempotent).
    blk = pl.program_id(1) * block_stride + j

    if needs_mask:
        lane = lax.broadcasted_iota(jnp.int32, (rows, 128), 1)
        n_valid = hw - blk * thw      # valid lanes in this block (< thw only on tail)

    def load_chunk(k):
        off = k * 128
        if not isinstance(off, int):
            off = pl.multiple_of(off, 128)
        v = x_ref[:, pl.ds(off, 128)]
        if needs_mask:
            v = jnp.where((lane + off) < n_valid, v, min_val)
        return v

    base = acc_ref[...]
    n_outer = n_chunks // nacc
    n_tail = n_chunks % nacc

    if n_outer > 0:
        # nacc independent running-max chains expose VALU parallelism; the
        # bounded fori_loop keeps code size and vreg live ranges flat even for
        # thousands of 128-lane chunks per tile.
        def body(it, accs):
            k0 = it * nacc
            return tuple(jnp.maximum(accs[a], load_chunk(k0 + a))
                         for a in range(nacc))

        init = (base,) + tuple(jnp.full(base.shape, min_val, base.dtype)
                               for _ in range(nacc - 1))
        accs = list(lax.fori_loop(0, n_outer, body, init))
    else:
        accs = [base]

    # Static tail chunks (< nacc of them).
    for t in range(n_tail):
        idx = t % len(accs)
        accs[idx] = jnp.maximum(accs[idx], load_chunk(n_outer * nacc + t))

    # Tree-combine the partial accumulators.
    while len(accs) > 1:
        nxt = [jnp.maximum(accs[i], accs[i + 1])
               for i in range(0, len(accs) - 1, 2)]
        if len(accs) % 2:
            nxt.append(accs[-1])
        accs = nxt
    acc_ref[...] = accs[0]

    @pl.when(j == pl.num_programs(2) - 1)
    def _finalize():
        # Single cross-lane (XLU) reduce per (row-tile, hw-split).
        o_ref[0] = jnp.max(acc_ref[...], axis=-1,
                           keepdims=True).astype(o_ref.dtype)


def maxpool_out(x, weight, bias, *, x_tile_bytes=8 * 1024 * 1024):
    """Global max-pool over (H, W) followed by Linear.

    x: (N, C, H, W) NCHW; weight: (categories, C) (PyTorch Linear layout);
    bias: (categories,). Returns (N, categories)."""
    n, c, h, w = x.shape
    nc = n * c
    hw = h * w
    dt = x.dtype
    itemsize = jnp.dtype(dt).itemsize
    min_val = _min_value(dt)

    # ---- layout: fold C into the sublane (row) dim; free reshape, no copy ----
    x2d = x.reshape(nc, hw)

    # ---- tiling ----
    sublane = max(8, 32 // itemsize)        # 8 (f32) / 16 (bf16) / 32 (int8)
    if nc <= 8:
        tn_rows = nc                        # full-dim block (allowed)
    else:
        tn_rows = min(256, (nc // 8) * 8)
    row_blocks = _cdiv(nc, tn_rows)

    # VMEM-aware hw tile: account for sublane padding of the row dim; keep the
    # double-buffered x tile comfortably inside scoped VMEM on v5e/v6e/v7x.
    x_tile_bytes = min(int(x_tile_bytes), 14 * 1024 * 1024)
    rows_padded = _round_up(tn_rows, sublane)
    bytes_per_chunk = rows_padded * 128 * itemsize
    max_chunks = max(1, x_tile_bytes // bytes_per_chunk)
    total_chunks = _cdiv(hw, 128)
    thw = int(min(max_chunks, total_chunks)) * 128

    total_blocks = _cdiv(hw, thw)
    # Give v7x's second TensorCore a parallel block when there is only one row
    # block: split the HW reduction in two (possibly overlapping) halves,
    # combined by a trivial max in the wrapper.  No effect on v5e/v6e (1 TC).
    hw_split = 2 if (row_blocks == 1 and total_blocks >= 2) else 1
    inner_blocks = _cdiv(total_blocks, hw_split)
    block_stride = total_blocks // hw_split   # in-bounds by construction

    needs_mask = (hw % thw) != 0
    # Independent partial-max chains per step; keep carried vregs bounded.
    nacc = int(max(1, min(8, (16 * 8) // max(8, tn_rows))))

    kernel = functools.partial(
        _global_max_kernel, hw=hw, thw=thw, block_stride=int(block_stride),
        nacc=nacc, min_val=min_val, needs_mask=needs_mask)

    def x_index_map(i, p, j, _stride=int(block_stride)):
        return (i, p * _stride + j)

    pooled_parts = pl.pallas_call(
        kernel,
        out_shape=jax.ShapeDtypeStruct((hw_split, nc, 1), dt),
        grid_spec=pltpu.PrefetchScalarGridSpec(
            num_scalar_prefetch=0,
            grid=(int(row_blocks), int(hw_split), int(inner_blocks)),
            in_specs=[pl.BlockSpec((tn_rows, thw), x_index_map)],
            out_specs=pl.BlockSpec((1, tn_rows, 1), lambda i, p, j: (p, i, 0)),
            scratch_shapes=[pltpu.VMEM((tn_rows, 128), dt)],
        ),
        compiler_params=pltpu.CompilerParams(
            dimension_semantics=("parallel", "parallel", "arbitrary"),
            vmem_limit_bytes=32 * 1024 * 1024),
    )(x2d)

    # ---- tiny epilogue in plain XLA: combine splits + Linear ----
    pooled = jnp.max(pooled_parts[:, :, 0], axis=0)          # (N*C,)
    pooled = pooled.reshape(n, c).astype(jnp.float32)
    out = pooled @ weight.astype(jnp.float32).T + bias.astype(jnp.float32)
    return out.astype(jnp.result_type(dt, weight.dtype))


if __name__ == "__main__":
    # Module config: MaxPoolOut(in_planes=4, plane_size=16, categories=10)
    N, C, H, W = 2, 4, 16, 16
    CATEGORIES = 10

    key = jax.random.PRNGKey(0)
    kx, kw, kb = jax.random.split(key, 3)

    x = jax.random.normal(kx, (N, C, H, W), dtype=jnp.float32)
    # PyTorch Linear layout: weight (out_features, in_features)
    bound = 1.0 / (C ** 0.5)
    weight = jax.random.uniform(kw, (CATEGORIES, C), minval=-bound,
                                maxval=bound, dtype=jnp.float32)
    bias = jax.random.uniform(kb, (CATEGORIES,), minval=-bound, maxval=bound,
                              dtype=jnp.float32)

    out = maxpool_out(x, weight, bias)
    out = jax.block_until_ready(out)

    ref = jnp.max(x, axis=(2, 3)) @ weight.T + bias
    assert out.shape == (N, CATEGORIES)
    assert jnp.allclose(out, ref, atol=1e-5, rtol=1e-5)

    # Extra coverage: ragged H*W (in-kernel tail masking path).
    x2 = jax.random.normal(kx, (N, C, 15, 15), dtype=jnp.float32)
    out2 = jax.block_until_ready(maxpool_out(x2, weight, bias))
    ref2 = jnp.max(x2, axis=(2, 3)) @ weight.T + bias
    assert jnp.allclose(out2, ref2, atol=1e-5, rtol=1e-5)

    # Extra coverage: multi-block HW reduction with the 2-way parallel split.
    x3 = jax.random.normal(kx, (N, C, 16, 24), dtype=jnp.float32)
    out3 = jax.block_until_ready(maxpool_out(x3, weight, bias,
                                             x_tile_bytes=4096))
    ref3 = jnp.max(x3, axis=(2, 3)) @ weight.T + bias
    assert jnp.allclose(out3, ref3, atol=1e-5, rtol=1e-5)

    print("KERNEL_OK")
</pallas_src>

<mosaic_0001>
module attributes {stable_mosaic.version = 11 : i64} {
  func.func @_global_max_kernel(%arg0: i32, %arg1: i32, %arg2: i32, %arg3: memref<8x256xf32, #tpu.memory_space<vmem>>, %arg4: memref<1x8x1xf32, #tpu.memory_space<vmem>>, %arg5: memref<8x128xf32, #tpu.memory_space<vmem>>) attributes {dimension_semantics = [#tpu.dimension_semantics<parallel>, #tpu.dimension_semantics<parallel>, #tpu.dimension_semantics<arbitrary>], iteration_bounds = array<i64: 1, 1, 1>, scalar_prefetch = 0 : i64, scratch_operands = 1 : i64, tpu.core_type = #tpu.core_type<tc>, window_params = [{transform_indices = @transform_0, window_bounds = array<i64: 8, 256>}, {transform_indices = @transform_1, window_bounds = array<i64: 1, 8, 1>}]} {
    %c0_i32 = arith.constant 0 : i32
    %0 = arith.cmpi eq, %arg2, %c0_i32 : i32
    %1 = arith.extui %0 : i1 to i32
    %c0_i32_0 = arith.constant 0 : i32
    %2 = arith.cmpi ne, %1, %c0_i32_0 : i32
    scf.if %2 {
      %cst = arith.constant 0xFF800000 : f32
      %12 = vector.broadcast %cst : f32 to vector<8x128xf32>
      %c0_9 = arith.constant 0 : index
      %c0_10 = arith.constant 0 : index
      %13 = vector.load %arg5[%c0_9, %c0_10] : memref<8x128xf32, #tpu.memory_space<vmem>>, vector<8x128xf32>
      tpu.vector_store %arg5[%c0_9, %c0_10], %12 {strides = array<i32>} : memref<8x128xf32, #tpu.memory_space<vmem>>, vector<8x128xf32>,
    } else {
    }
    %c0 = arith.constant 0 : index
    %c0_1 = arith.constant 0 : index
    %3 = vector.load %arg5[%c0, %c0_1] : memref<8x128xf32, #tpu.memory_space<vmem>>, vector<8x128xf32>
    %c0_2 = arith.constant 0 : index
    %c0_3 = arith.constant 0 : index
    %4 = vector.load %arg3[%c0_2, %c0_3] : memref<8x256xf32, #tpu.memory_space<vmem>>, vector<8x128xf32>
    %5 = arith.maximumf %3, %4 : vector<8x128xf32>
    %c0_4 = arith.constant 0 : index
    %c128 = arith.constant 128 : index
    %6 = vector.load %arg3[%c0_4, %c128] : memref<8x256xf32, #tpu.memory_space<vmem>>, vector<8x128xf32>
    %7 = arith.maximumf %5, %6 : vector<8x128xf32>
    %c0_5 = arith.constant 0 : index
    %c0_6 = arith.constant 0 : index
    %8 = vector.load %arg5[%c0_5, %c0_6] : memref<8x128xf32, #tpu.memory_space<vmem>>, vector<8x128xf32>
    tpu.vector_store %arg5[%c0_5, %c0_6], %7 {strides = array<i32>} : memref<8x128xf32, #tpu.memory_space<vmem>>, vector<8x128xf32>,
    %c0_i32_7 = arith.constant 0 : i32
    %9 = arith.cmpi eq, %arg2, %c0_i32_7 : i32
    %10 = arith.extui %9 : i1 to i32
    %c0_i32_8 = arith.constant 0 : i32
    %11 = arith.cmpi ne, %10, %c0_i32_8 : i32
    scf.if %11 {
      %c0_9 = arith.constant 0 : index
      %c0_10 = arith.constant 0 : index
      %12 = vector.load %arg5[%c0_9, %c0_10] : memref<8x128xf32, #tpu.memory_space<vmem>>, vector<8x128xf32>
      %cst = arith.constant dense<0xFF800000> : vector<8xf32>
      %13 = vector.multi_reduction <maximumf>, %12, %cst [1] : vector<8x128xf32> to vector<8xf32>
      %14 = vector.shape_cast %13 : vector<8xf32> to vector<8x1xf32>
      %c0_11 = arith.constant 0 : index
      %c0_12 = arith.constant 0 : index
      %c0_13 = arith.constant 0 : index
      %15 = vector.load %arg4[%c0_11, %c0_12, %c0_13] : memref<1x8x1xf32, #tpu.memory_space<vmem>>, vector<1x8x1xf32>
      %16 = vector.shape_cast %15 : vector<1x8x1xf32> to vector<8x1xf32>
      %17 = vector.shape_cast %14 : vector<8x1xf32> to vector<1x8x1xf32>
      tpu.vector_store %arg4[%c0_11, %c0_12, %c0_13], %17 {strides = array<i32>} : memref<1x8x1xf32, #tpu.memory_space<vmem>>, vector<1x8x1xf32>,
    } else {
    }
    return
  }
  func.func @transform_0(%arg0: i32, %arg1: i32, %arg2: i32) -> (i32, i32) {
    %c1_i32 = arith.constant 1 : i32
    %0 = arith.muli %arg1, %c1_i32 : i32
    %1 = arith.addi %0, %arg2 : i32
    %c0_i32 = arith.constant 0 : i32
    return %arg0, %1 : i32, i32
  }
  func.func @transform_1(%arg0: i32, %arg1: i32, %arg2: i32) -> (i32, i32, i32) {
    %c0_i32 = arith.constant 0 : i32
    %c0_i32_0 = arith.constant 0 : i32
    return %arg1, %arg0, %c0_i32 : i32, i32, i32
  }
}

</mosaic_0001>

<bundles_post_ra>
// kernel: tpu_custom_call.1
= control target key start
LH: loop header
LB: loop body
LE: loop exit
PB: predicated region body
PF: predicated region fallthrough
CT: control target
= control target key end

     0   :  { %6 = vsyncpa [#allocation4], 0  ;;  %s75_s6 = smov [#allocation3]   ;;  %s101_s0 = inlined_call_operand.hbm [shape: f32[8,256], index: 0, kind: input, shape index: {}]   ;;  %s102_s1 = inlined_call_operand.vmem [shape: f32[1,8,1], index: 1, kind: output, shape index: {}]  }
   0x1   :  { %s17_s7 = sshll.u32 %s75_s6, 4  ;;  %s51_s10 = scalar_lea.hbm %s101_s0, 256  ;;  %s18_s7 = int_to_ptr.vmem [resolvable:$true] %s17_s7 }
   0x2   :  { %p52_p0 = scmp.ne.s32.totalorder %s101_s0, %s51_s10  ;;  %p55_p1 = scmp.lt.u32.totalorder %s51_s10, %s101_s0 }
   0x4   :  { %p57_p2 = pnand %p55_p1, %p52_p0 }
   0x6   :  { %60 = shalt.err (!%p57_p2)
}
   0x7   :  { %s61_s15 = scalar_lea.vmem %s18_s7, 256  ;;  %p66_p4 = scmp.lt.s32.totalorder %s18_s7, %s18_s7 }
   0x8   :  { %p62_p3 = scmp.ne.s32.totalorder %s18_s7, %s61_s15  ;;  %p67_p5 = scmp.lt.s32.totalorder %s61_s15, %s61_s15 }
   0xa   :  { %p68_p6 = por %p67_p5, %p66_p4 }
   0xc   :  { %p69_p7 = pnand %p68_p6, %p62_p3 }
   0xe   :  { %72 = shalt.err (!%p69_p7)
}
   0xf   :  { %20 = dma.hbm_to_vmem [thread:$0]  %s101_s0, 256, %s18_s7, [#allocation4]  }
  0x10   :  { %73 = dma.done.wait [#allocation4], 256  }
  0x11   :  { %74 = vsyncadd [#allocation4], 4294967040  ;;  %v32_v0 = vld [vmem:[#allocation3] sm:$0xff]  ;;  %v34_v1 = vld [vmem:[#allocation3 + $0x8] sm:$0xff]  ;;  %vm43_vm0 = vcmask 7168  }
  0x12   :  { %v35_v2 = vmax.f32 %v32_v0, %v34_v1 }
  0x14   :  { %41 = vmax.xlane.f32.xlu0 %v35_v2 }
  0xa1   :  { %v42_v3 = vpop.xlane.xlu0 %41 }
  0xa2   :  { %44 = vst.msk [vmem:[%s102_s1] sm:$0xff] %vm43_vm0, %v42_v3 }
  0xa3   :  { %49 = vsyncpa [#allocation4], 1 }

</bundles_post_ra>
